<compile_context>
chip_gen: v7x
topology: tpu7x:2x2x1
jax: 0.10.0
libtpu: 0.0.40
codegen_flags: <defaults>
</compile_context>

<pallas_src>
import math
import functools

import jax
import jax.numpy as jnp
from jax import lax
from jax.experimental import pallas as pl
from jax.experimental.pallas import tpu as pltpu


# --------------------------------- helpers ---------------------------------

def _pick_tk(d_model, cap=512):
    """K-reduction tile for the projection matmuls (must divide d_model)."""
    if d_model <= cap:
        return d_model
    for tk in (512, 256, 128):
        if d_model % tk == 0:
            return tk
    return d_model  # odd d_model: keep full K resident


def _vmem_limit(nbytes):
    """Scoped-VMEM budget: double-buffered block bytes + headroom.
    Floored at 32 MiB so tiny shapes never under-provision; capped at 96 MiB."""
    return int(min(96 << 20, max(32 << 20, 1.5 * nbytes + (4 << 20))))


# -------------- fused QKV projection, self-attention fast path --------------

def _qkv_self_kernel(x_ref, w_ref, b_ref, q_ref, k_ref, v_ref, acc_ref, *, d_model):
    kk = pl.program_id(1)

    @pl.when(kk == 0)
    def _():
        acc_ref[...] = jnp.zeros_like(acc_ref)

    # One wide matmul (tm, tk) @ (tk, 3*d_model): bf16 operands, f32 accumulate.
    acc_ref[...] += jnp.dot(x_ref[...].astype(jnp.bfloat16), w_ref[...],
                            preferred_element_type=jnp.float32)

    @pl.when(kk == pl.num_programs(1) - 1)
    def _():
        acc = acc_ref[...]
        q_ref[...] = (acc[:, :d_model] + b_ref[0:1, :]).astype(q_ref.dtype)
        k_ref[...] = (acc[:, d_model:2 * d_model] + b_ref[1:2, :]).astype(k_ref.dtype)
        v_ref[...] = (acc[:, 2 * d_model:] + b_ref[2:3, :]).astype(v_ref.dtype)


def qkv_project_self(x, w_fused, b3, *, tm=512):
    """x (N, D) f32, w_fused (D, 3D) bf16 ([wq*scale | wk | wv]), b3 (3, D) f32
    -> (Q, K, V) each (N, D) bf16."""
    N, d_model = x.shape
    tm = min(tm, N)
    tk = _pick_tk(d_model)
    kt = d_model // tk
    nbytes = (2 * tm * tk * 4 + 2 * tk * 3 * d_model * 2 + 2 * 3 * d_model * 4
              + 3 * 2 * tm * d_model * 2 + tm * 3 * d_model * 4)
    out = jax.ShapeDtypeStruct((N, d_model), jnp.bfloat16)
    o_spec = pl.BlockSpec((tm, d_model), lambda i, kk: (i, 0))
    return pl.pallas_call(
        functools.partial(_qkv_self_kernel, d_model=d_model),
        out_shape=(out, out, out),
        grid=(pl.cdiv(N, tm), kt),
        in_specs=[pl.BlockSpec((tm, tk), lambda i, kk: (i, kk)),
                  pl.BlockSpec((tk, 3 * d_model), lambda i, kk: (kk, 0)),
                  pl.BlockSpec((3, d_model), lambda i, kk: (0, 0))],
        out_specs=(o_spec, o_spec, o_spec),
        scratch_shapes=[pltpu.VMEM((tm, 3 * d_model), jnp.float32)],
        compiler_params=pltpu.CompilerParams(
            dimension_semantics=("parallel", "arbitrary"),
            vmem_limit_bytes=_vmem_limit(nbytes)),
    )(x, w_fused, b3)


# ----------------- QKV projection, cross-attention path -----------------

def _qkv_cross_kernel(xq_ref, xk_ref, xv_ref, wq_ref, wk_ref, wv_ref, b_ref,
                      q_ref, k_ref, v_ref, aq_ref, ak_ref, av_ref):
    kk = pl.program_id(1)

    @pl.when(kk == 0)
    def _():
        aq_ref[...] = jnp.zeros_like(aq_ref)
        ak_ref[...] = jnp.zeros_like(ak_ref)
        av_ref[...] = jnp.zeros_like(av_ref)

    aq_ref[...] += jnp.dot(xq_ref[...].astype(jnp.bfloat16), wq_ref[...],
                           preferred_element_type=jnp.float32)
    ak_ref[...] += jnp.dot(xk_ref[...].astype(jnp.bfloat16), wk_ref[...],
                           preferred_element_type=jnp.float32)
    av_ref[...] += jnp.dot(xv_ref[...].astype(jnp.bfloat16), wv_ref[...],
                           preferred_element_type=jnp.float32)

    @pl.when(kk == pl.num_programs(1) - 1)
    def _():
        q_ref[...] = (aq_ref[...] + b_ref[0:1, :]).astype(q_ref.dtype)
        k_ref[...] = (ak_ref[...] + b_ref[1:2, :]).astype(k_ref.dtype)
        v_ref[...] = (av_ref[...] + b_ref[2:3, :]).astype(v_ref.dtype)


def qkv_project_cross(xq, xk, xv, wq, wk, wv, b3, *, tm=512):
    """Three (N, D) f32 inputs, three (D, D) bf16 weights, b3 (3, D) f32
    -> (Q, K, V) each (N, D) bf16 in one launch (one shared row/K grid)."""
    N, d_model = xq.shape
    tm = min(tm, N)
    tk = _pick_tk(d_model)
    kt = d_model // tk
    nbytes = (3 * 2 * tm * tk * 4 + 3 * 2 * tk * d_model * 2 + 2 * 3 * d_model * 4
              + 3 * 2 * tm * d_model * 2 + 3 * tm * d_model * 4)
    x_spec = pl.BlockSpec((tm, tk), lambda i, kk: (i, kk))
    w_spec = pl.BlockSpec((tk, d_model), lambda i, kk: (kk, 0))
    o_spec = pl.BlockSpec((tm, d_model), lambda i, kk: (i, 0))
    out = jax.ShapeDtypeStruct((N, d_model), jnp.bfloat16)
    return pl.pallas_call(
        _qkv_cross_kernel,
        out_shape=(out, out, out),
        grid=(pl.cdiv(N, tm), kt),
        in_specs=[x_spec, x_spec, x_spec, w_spec, w_spec, w_spec,
                  pl.BlockSpec((3, d_model), lambda i, kk: (0, 0))],
        out_specs=(o_spec, o_spec, o_spec),
        scratch_shapes=[pltpu.VMEM((tm, d_model), jnp.float32) for _ in range(3)],
        compiler_params=pltpu.CompilerParams(
            dimension_semantics=("parallel", "arbitrary"),
            vmem_limit_bytes=_vmem_limit(nbytes)),
    )(xq, xk, xv, wq, wk, wv, b3)


# ---------- attention (all heads) with fused output projection ----------

def _attn_kernel(q_ref, k_ref, v_ref, wo_ref, bo_ref, o_ref, acc_ref,
                 *, num_heads, d_model):
    d_k = d_model // num_heads
    acc_ref[...] = jnp.zeros_like(acc_ref)
    # Static unroll over heads; each head's (tq, S) scores and (tq, d_k) context
    # are folded into the (tq, d_model) f32 VMEM accumulator before the next head.
    for h in range(num_heads):
        lo = h * d_k
        q = q_ref[:, lo:lo + d_k]                       # bf16; 1/sqrt(d_k) baked in
        k = k_ref[:, lo:lo + d_k]                       # bf16 (S, d_k)
        v = v_ref[:, lo:lo + d_k]                       # bf16 (S, d_k)
        # q @ k.T via dot_general contracting d_k (no explicit transpose); f32 acc.
        s = lax.dot_general(q, k, (((1,), (1,)), ((), ())),
                            preferred_element_type=jnp.float32)       # (tq, S)
        m = jnp.max(s, axis=-1, keepdims=True)
        e = jnp.exp(s - m)
        p = e * pl.reciprocal(jnp.sum(e, axis=-1, keepdims=True), approx=True)
        ctx = jnp.dot(p.astype(jnp.bfloat16), v,
                      preferred_element_type=jnp.float32)              # (tq, d_k)
        # Fused output projection: this head's row-slab of W_o, accumulated in f32.
        acc_ref[...] += jnp.dot(ctx.astype(jnp.bfloat16), wo_ref[lo:lo + d_k, :],
                                preferred_element_type=jnp.float32)    # (tq, d_model)
    o_ref[...] = (acc_ref[...] + bo_ref[...]).astype(o_ref.dtype)


def attention_out_proj(Q, K, V, wo, bo, num_heads, *, tq=256, out_dtype=jnp.float32):
    """Q, K, V: (B, S, d_model) bf16 (scale folded into Q); wo (D, D) bf16; bo (1, D) f32.
    Returns softmax(Q K^T) V @ wo + bo : (B, S, d_model)."""
    B, S, d_model = Q.shape
    tq = min(tq, S)
    nbytes = (2 * tq * d_model * 2            # q tile (bf16, double-buffered)
              + 2 * 2 * S * d_model * 2       # k, v full-S blocks (bf16)
              + 2 * d_model * d_model * 2     # wo (bf16)
              + 2 * d_model * 4               # bo
              + 2 * tq * d_model * 4          # output tile (f32)
              + tq * d_model * 4              # acc scratch
              + 4 * tq * S * 4)               # per-head score intermediates margin
    kernel = functools.partial(_attn_kernel, num_heads=num_heads, d_model=d_model)
    return pl.pallas_call(
        kernel,
        out_shape=jax.ShapeDtypeStruct((B, S, d_model), out_dtype),
        grid=(B, pl.cdiv(S, tq)),
        in_specs=[pl.BlockSpec((None, tq, d_model), lambda b, i: (b, i, 0)),
                  pl.BlockSpec((None, S, d_model), lambda b, i: (b, 0, 0)),
                  pl.BlockSpec((None, S, d_model), lambda b, i: (b, 0, 0)),
                  pl.BlockSpec((d_model, d_model), lambda b, i: (0, 0)),
                  pl.BlockSpec((1, d_model), lambda b, i: (0, 0))],
        out_specs=pl.BlockSpec((None, tq, d_model), lambda b, i: (b, i, 0)),
        scratch_shapes=[pltpu.VMEM((tq, d_model), jnp.float32)],
        compiler_params=pltpu.CompilerParams(
            dimension_semantics=("parallel", "parallel"),
            vmem_limit_bytes=_vmem_limit(nbytes)),
    )(Q, K, V, wo, bo)


# ----------------------------- module-level wrapper -----------------------------

def init_params(key, d_model):
    """Deterministic init of the 4 Linear(d_model, d_model) layers."""
    keys = jax.random.split(key, 8)
    bound = 1.0 / math.sqrt(d_model)
    params = []
    for i in range(4):
        w = jax.random.uniform(keys[2 * i], (d_model, d_model),
                               jnp.float32, -bound, bound)
        b = jax.random.uniform(keys[2 * i + 1], (1, d_model),
                               jnp.float32, -bound, bound)
        params.append((w, b))  # stored as (Din, Dout): y = x @ w + b
    return params


def multi_header_attention(params, q, k, v, d_headers, *, tm=512, tq=256):
    """q, k, v: (B, S, d_model) -> (B, S, d_model)."""
    B, S, d_model = q.shape
    assert d_model % d_headers == 0, "d_model must be divisible by d_headers"
    assert k.shape == v.shape and k.shape[0] == B and k.shape[2] == d_model
    # TODO(synk): cross-attention with S_kv != S_q not supported (row-fused projections).
    assert k.shape[1] == S

    d_k = d_model // d_headers
    (wq, bq), (wk, bk), (wv, bv), (wo, bo) = params

    # Fold 1/sqrt(d_k) into the Q projection — scale in f32 FIRST, then bf16 cast.
    scale = 1.0 / math.sqrt(d_k)
    wq_s = wq * scale
    bq_s = bq * scale
    b3 = jnp.concatenate([bq_s, bk, bv], axis=0)          # (3, d_model) f32

    N = B * S
    if (q is k) and (q is v):
        # Self-attention fast path: one fused (d_model, 3*d_model) weight.
        w_fused = jnp.concatenate([wq_s, wk, wv], axis=1).astype(jnp.bfloat16)
        Qp, Kp, Vp = qkv_project_self(q.reshape(N, d_model), w_fused, b3, tm=tm)
    else:
        Qp, Kp, Vp = qkv_project_cross(
            q.reshape(N, d_model), k.reshape(N, d_model), v.reshape(N, d_model),
            wq_s.astype(jnp.bfloat16), wk.astype(jnp.bfloat16),
            wv.astype(jnp.bfloat16), b3, tm=tm)

    Qp = Qp.reshape(B, S, d_model)    # free reshapes, no relayout
    Kp = Kp.reshape(B, S, d_model)
    Vp = Vp.reshape(B, S, d_model)

    # Attention + fused output projection (no HBM round trip for the context).
    return attention_out_proj(Qp, Kp, Vp, wo.astype(jnp.bfloat16), bo,
                              d_headers, tq=tq, out_dtype=q.dtype)


# ------------------------------------ reference -----------------------------------

def reference(params, q, k, v, d_headers):
    B, S, d_model = q.shape
    d_k = d_model // d_headers
    (wq, bq), (wk, bk), (wv, bv), (wo, bo) = params

    def proj(x, w, b):
        y = x @ w + b
        return y.reshape(B, S, d_headers, d_k).transpose(0, 2, 1, 3)

    qh, kh, vh = proj(q, wq, bq), proj(k, wk, bk), proj(v, wv, bv)
    s = jnp.einsum("bhqd,bhkd->bhqk", qh, kh) / math.sqrt(d_k)
    p = jax.nn.softmax(s, axis=-1)
    oh = jnp.einsum("bhqk,bhkd->bhqd", p, vh)
    merged = oh.transpose(0, 2, 1, 3).reshape(B, S, d_model)
    return merged @ wo + bo


# --------------------------------------- main --------------------------------------

if __name__ == "__main__":
    B, S, d_model, d_headers = 2, 8, 32, 4

    key = jax.random.PRNGKey(0)
    kp, kq, kk_, kv_ = jax.random.split(key, 4)
    params = init_params(kp, d_model)
    q = jax.random.normal(kq, (B, S, d_model), jnp.float32)
    k = jax.random.normal(kk_, (B, S, d_model), jnp.float32)
    v = jax.random.normal(kv_, (B, S, d_model), jnp.float32)

    # Cross-attention path (distinct q/k/v tensors).
    out = multi_header_attention(params, q, k, v, d_headers)
    out = jax.block_until_ready(out)
    ref = reference(params, q, k, v, d_headers)
    assert out.shape == (B, S, d_model)
    # bf16 MXU operands + approx reciprocal -> looser tolerance than pure-f32 path.
    assert jnp.allclose(out, ref, atol=5e-2, rtol=5e-2), "cross-attention mismatch"

    # Self-attention fast path (single fused-weight matmul).
    out_self = multi_header_attention(params, q, q, q, d_headers)
    out_self = jax.block_until_ready(out_self)
    ref_self = reference(params, q, q, q, d_headers)
    assert jnp.allclose(out_self, ref_self, atol=5e-2, rtol=5e-2), "self-attention mismatch"

    print("KERNEL_OK")
</pallas_src>

<mosaic_0001>
module attributes {stable_mosaic.version = 11 : i64} {
  func.func @_qkv_cross_kernel(%arg0: i32, %arg1: i32, %arg2: memref<16x32xf32, #tpu.memory_space<vmem>>, %arg3: memref<16x32xf32, #tpu.memory_space<vmem>>, %arg4: memref<16x32xf32, #tpu.memory_space<vmem>>, %arg5: memref<32x32xbf16, #tpu.memory_space<vmem>>, %arg6: memref<32x32xbf16, #tpu.memory_space<vmem>>, %arg7: memref<32x32xbf16, #tpu.memory_space<vmem>>, %arg8: memref<3x32xf32, #tpu.memory_space<vmem>>, %arg9: memref<16x32xbf16, #tpu.memory_space<vmem>>, %arg10: memref<16x32xbf16, #tpu.memory_space<vmem>>, %arg11: memref<16x32xbf16, #tpu.memory_space<vmem>>, %arg12: memref<16x32xf32, #tpu.memory_space<vmem>>, %arg13: memref<16x32xf32, #tpu.memory_space<vmem>>, %arg14: memref<16x32xf32, #tpu.memory_space<vmem>>) attributes {dimension_semantics = [#tpu.dimension_semantics<parallel>, #tpu.dimension_semantics<arbitrary>], iteration_bounds = array<i64: 1, 1>, scalar_prefetch = 0 : i64, scratch_operands = 3 : i64, tpu.core_type = #tpu.core_type<tc>, window_params = [{transform_indices = @transform_0, window_bounds = array<i64: 16, 32>}, {transform_indices = @transform_1, window_bounds = array<i64: 16, 32>}, {transform_indices = @transform_2, window_bounds = array<i64: 16, 32>}, {transform_indices = @transform_3, window_bounds = array<i64: 32, 32>}, {transform_indices = @transform_4, window_bounds = array<i64: 32, 32>}, {transform_indices = @transform_5, window_bounds = array<i64: 32, 32>}, {pipeline_mode = #tpu.pipeline_mode<synchronous>, transform_indices = @transform_6, window_bounds = array<i64: 3, 32>}, {transform_indices = @transform_7, window_bounds = array<i64: 16, 32>}, {transform_indices = @transform_8, window_bounds = array<i64: 16, 32>}, {transform_indices = @transform_9, window_bounds = array<i64: 16, 32>}]} {
    %c0_i32 = arith.constant 0 : i32
    %0 = arith.cmpi eq, %arg1, %c0_i32 : i32
    %1 = arith.extui %0 : i1 to i32
    %c0_i32_0 = arith.constant 0 : i32
    %2 = arith.cmpi ne, %1, %c0_i32_0 : i32
    scf.if %2 {
      %cst_28 = arith.constant 0.000000e+00 : f32
      %27 = vector.broadcast %cst_28 : f32 to vector<16x32xf32>
      %c0_29 = arith.constant 0 : index
      %c0_30 = arith.constant 0 : index
      %28 = vector.load %arg12[%c0_29, %c0_30] : memref<16x32xf32, #tpu.memory_space<vmem>>, vector<16x32xf32>
      tpu.vector_store %arg12[%c0_29, %c0_30], %27 {strides = array<i32>} : memref<16x32xf32, #tpu.memory_space<vmem>>, vector<16x32xf32>,
      %cst_31 = arith.constant 0.000000e+00 : f32
      %29 = vector.broadcast %cst_31 : f32 to vector<16x32xf32>
      %c0_32 = arith.constant 0 : index
      %c0_33 = arith.constant 0 : index
      %30 = vector.load %arg13[%c0_32, %c0_33] : memref<16x32xf32, #tpu.memory_space<vmem>>, vector<16x32xf32>
      tpu.vector_store %arg13[%c0_32, %c0_33], %29 {strides = array<i32>} : memref<16x32xf32, #tpu.memory_space<vmem>>, vector<16x32xf32>,
      %cst_34 = arith.constant 0.000000e+00 : f32
      %31 = vector.broadcast %cst_34 : f32 to vector<16x32xf32>
      %c0_35 = arith.constant 0 : index
      %c0_36 = arith.constant 0 : index
      %32 = vector.load %arg14[%c0_35, %c0_36] : memref<16x32xf32, #tpu.memory_space<vmem>>, vector<16x32xf32>
      tpu.vector_store %arg14[%c0_35, %c0_36], %31 {strides = array<i32>} : memref<16x32xf32, #tpu.memory_space<vmem>>, vector<16x32xf32>,
    } else {
    }
    %c0 = arith.constant 0 : index
    %c0_1 = arith.constant 0 : index
    %3 = vector.load %arg12[%c0, %c0_1] : memref<16x32xf32, #tpu.memory_space<vmem>>, vector<16x32xf32>
    %c0_2 = arith.constant 0 : index
    %c0_3 = arith.constant 0 : index
    %4 = vector.load %arg2[%c0_2, %c0_3] : memref<16x32xf32, #tpu.memory_space<vmem>>, vector<16x32xf32>
    %5 = arith.truncf %4 : vector<16x32xf32> to vector<16x32xbf16>
    %c0_4 = arith.constant 0 : index
    %c0_5 = arith.constant 0 : index
    %6 = vector.load %arg5[%c0_4, %c0_5] : memref<32x32xbf16, #tpu.memory_space<vmem>>, vector<32x32xbf16>
    %cst = arith.constant dense<0.000000e+00> : vector<16x32xf32>
    %7 = tpu.matmul %5, %6, %cst {dimension_numbers = #tpu.dot_dimension_numbers<[1], [0], [0], [1], [0, 0, 1, 1], [], []>} : vector<16x32xbf16>, vector<32x32xbf16>, vector<16x32xf32> -> vector<16x32xf32>
    %8 = arith.addf %3, %7 : vector<16x32xf32>
    %c0_6 = arith.constant 0 : index
    %c0_7 = arith.constant 0 : index
    %9 = vector.load %arg12[%c0_6, %c0_7] : memref<16x32xf32, #tpu.memory_space<vmem>>, vector<16x32xf32>
    tpu.vector_store %arg12[%c0_6, %c0_7], %8 {strides = array<i32>} : memref<16x32xf32, #tpu.memory_space<vmem>>, vector<16x32xf32>,
    %c0_8 = arith.constant 0 : index
    %c0_9 = arith.constant 0 : index
    %10 = vector.load %arg13[%c0_8, %c0_9] : memref<16x32xf32, #tpu.memory_space<vmem>>, vector<16x32xf32>
    %c0_10 = arith.constant 0 : index
    %c0_11 = arith.constant 0 : index
    %11 = vector.load %arg3[%c0_10, %c0_11] : memref<16x32xf32, #tpu.memory_space<vmem>>, vector<16x32xf32>
    %12 = arith.truncf %11 : vector<16x32xf32> to vector<16x32xbf16>
    %c0_12 = arith.constant 0 : index
    %c0_13 = arith.constant 0 : index
    %13 = vector.load %arg6[%c0_12, %c0_13] : memref<32x32xbf16, #tpu.memory_space<vmem>>, vector<32x32xbf16>
    %cst_14 = arith.constant dense<0.000000e+00> : vector<16x32xf32>
    %14 = tpu.matmul %12, %13, %cst_14 {dimension_numbers = #tpu.dot_dimension_numbers<[1], [0], [0], [1], [0, 0, 1, 1], [], []>} : vector<16x32xbf16>, vector<32x32xbf16>, vector<16x32xf32> -> vector<16x32xf32>
    %15 = arith.addf %10, %14 : vector<16x32xf32>
    %c0_15 = arith.constant 0 : index
    %c0_16 = arith.constant 0 : index
    %16 = vector.load %arg13[%c0_15, %c0_16] : memref<16x32xf32, #tpu.memory_space<vmem>>, vector<16x32xf32>
    tpu.vector_store %arg13[%c0_15, %c0_16], %15 {strides = array<i32>} : memref<16x32xf32, #tpu.memory_space<vmem>>, vector<16x32xf32>,
    %c0_17 = arith.constant 0 : index
    %c0_18 = arith.constant 0 : index
    %17 = vector.load %arg14[%c0_17, %c0_18] : memref<16x32xf32, #tpu.memory_space<vmem>>, vector<16x32xf32>
    %c0_19 = arith.constant 0 : index
    %c0_20 = arith.constant 0 : index
    %18 = vector.load %arg4[%c0_19, %c0_20] : memref<16x32xf32, #tpu.memory_space<vmem>>, vector<16x32xf32>
    %19 = arith.truncf %18 : vector<16x32xf32> to vector<16x32xbf16>
    %c0_21 = arith.constant 0 : index
    %c0_22 = arith.constant 0 : index
    %20 = vector.load %arg7[%c0_21, %c0_22] : memref<32x32xbf16, #tpu.memory_space<vmem>>, vector<32x32xbf16>
    %cst_23 = arith.constant dense<0.000000e+00> : vector<16x32xf32>
    %21 = tpu.matmul %19, %20, %cst_23 {dimension_numbers = #tpu.dot_dimension_numbers<[1], [0], [0], [1], [0, 0, 1, 1], [], []>} : vector<16x32xbf16>, vector<32x32xbf16>, vector<16x32xf32> -> vector<16x32xf32>
    %22 = arith.addf %17, %21 : vector<16x32xf32>
    %c0_24 = arith.constant 0 : index
    %c0_25 = arith.constant 0 : index
    %23 = vector.load %arg14[%c0_24, %c0_25] : memref<16x32xf32, #tpu.memory_space<vmem>>, vector<16x32xf32>
    tpu.vector_store %arg14[%c0_24, %c0_25], %22 {strides = array<i32>} : memref<16x32xf32, #tpu.memory_space<vmem>>, vector<16x32xf32>,
    %c0_i32_26 = arith.constant 0 : i32
    %24 = arith.cmpi eq, %arg1, %c0_i32_26 : i32
    %25 = arith.extui %24 : i1 to i32
    %c0_i32_27 = arith.constant 0 : i32
    %26 = arith.cmpi ne, %25, %c0_i32_27 : i32
    scf.if %26 {
      %c0_28 = arith.constant 0 : index
      %c0_29 = arith.constant 0 : index
      %27 = vector.load %arg12[%c0_28, %c0_29] : memref<16x32xf32, #tpu.memory_space<vmem>>, vector<16x32xf32>
      %c0_30 = arith.constant 0 : index
      %c0_31 = arith.constant 0 : index
      %28 = vector.load %arg8[%c0_30, %c0_31] : memref<3x32xf32, #tpu.memory_space<vmem>>, vector<1x32xf32>
      %29 = vector.broadcast %28 : vector<1x32xf32> to vector<16x32xf32>
      %30 = arith.addf %27, %29 : vector<16x32xf32>
      %31 = arith.truncf %30 : vector<16x32xf32> to vector<16x32xbf16>
      %c0_32 = arith.constant 0 : index
      %c0_33 = arith.constant 0 : index
      %32 = vector.load %arg9[%c0_32, %c0_33] : memref<16x32xbf16, #tpu.memory_space<vmem>>, vector<16x32xbf16>
      tpu.vector_store %arg9[%c0_32, %c0_33], %31 {strides = array<i32>} : memref<16x32xbf16, #tpu.memory_space<vmem>>, vector<16x32xbf16>,
      %c0_34 = arith.constant 0 : index
      %c0_35 = arith.constant 0 : index
      %33 = vector.load %arg13[%c0_34, %c0_35] : memref<16x32xf32, #tpu.memory_space<vmem>>, vector<16x32xf32>
      %c1 = arith.constant 1 : index
      %c0_36 = arith.constant 0 : index
      %34 = vector.load %arg8[%c1, %c0_36] : memref<3x32xf32, #tpu.memory_space<vmem>>, vector<1x32xf32>
      %35 = vector.broadcast %34 : vector<1x32xf32> to vector<16x32xf32>
      %36 = arith.addf %33, %35 : vector<16x32xf32>
      %37 = arith.truncf %36 : vector<16x32xf32> to vector<16x32xbf16>
      %c0_37 = arith.constant 0 : index
      %c0_38 = arith.constant 0 : index
      %38 = vector.load %arg10[%c0_37, %c0_38] : memref<16x32xbf16, #tpu.memory_space<vmem>>, vector<16x32xbf16>
      tpu.vector_store %arg10[%c0_37, %c0_38], %37 {strides = array<i32>} : memref<16x32xbf16, #tpu.memory_space<vmem>>, vector<16x32xbf16>,
      %c0_39 = arith.constant 0 : index
      %c0_40 = arith.constant 0 : index
      %39 = vector.load %arg14[%c0_39, %c0_40] : memref<16x32xf32, #tpu.memory_space<vmem>>, vector<16x32xf32>
      %c2 = arith.constant 2 : index
      %c0_41 = arith.constant 0 : index
      %40 = vector.load %arg8[%c2, %c0_41] : memref<3x32xf32, #tpu.memory_space<vmem>>, vector<1x32xf32>
      %41 = vector.broadcast %40 : vector<1x32xf32> to vector<16x32xf32>
      %42 = arith.addf %39, %41 : vector<16x32xf32>
      %43 = arith.truncf %42 : vector<16x32xf32> to vector<16x32xbf16>
      %c0_42 = arith.constant 0 : index
      %c0_43 = arith.constant 0 : index
      %44 = vector.load %arg11[%c0_42, %c0_43] : memref<16x32xbf16, #tpu.memory_space<vmem>>, vector<16x32xbf16>
      tpu.vector_store %arg11[%c0_42, %c0_43], %43 {strides = array<i32>} : memref<16x32xbf16, #tpu.memory_space<vmem>>, vector<16x32xbf16>,
    } else {
    }
    return
  }
  func.func @transform_0(%arg0: i32, %arg1: i32) -> (i32, i32) {
    %c0_i32 = arith.constant 0 : i32
    return %arg0, %arg1 : i32, i32
  }
  func.func @transform_1(%arg0: i32, %arg1: i32) -> (i32, i32) {
    %c0_i32 = arith.constant 0 : i32
    return %arg0, %arg1 : i32, i32
  }
  func.func @transform_2(%arg0: i32, %arg1: i32) -> (i32, i32) {
    %c0_i32 = arith.constant 0 : i32
    return %arg0, %arg1 : i32, i32
  }
  func.func @transform_3(%arg0: i32, %arg1: i32) -> (i32, i32) {
    %c0_i32 = arith.constant 0 : i32
    %c0_i32_0 = arith.constant 0 : i32
    return %arg1, %c0_i32 : i32, i32
  }
  func.func @transform_4(%arg0: i32, %arg1: i32) -> (i32, i32) {
    %c0_i32 = arith.constant 0 : i32
    %c0_i32_0 = arith.constant 0 : i32
    return %arg1, %c0_i32 : i32, i32
  }
  func.func @transform_5(%arg0: i32, %arg1: i32) -> (i32, i32) {
    %c0_i32 = arith.constant 0 : i32
    %c0_i32_0 = arith.constant 0 : i32
    return %arg1, %c0_i32 : i32, i32
  }
  func.func @transform_6(%arg0: i32, %arg1: i32) -> (i32, i32) {
    %c0_i32 = arith.constant 0 : i32
    %c0_i32_0 = arith.constant 0 : i32
    %c0_i32_1 = arith.constant 0 : i32
    return %c0_i32, %c0_i32_0 : i32, i32
  }
  func.func @transform_7(%arg0: i32, %arg1: i32) -> (i32, i32) {
    %c0_i32 = arith.constant 0 : i32
    %c0_i32_0 = arith.constant 0 : i32
    return %arg0, %c0_i32 : i32, i32
  }
  func.func @transform_8(%arg0: i32, %arg1: i32) -> (i32, i32) {
    %c0_i32 = arith.constant 0 : i32
    %c0_i32_0 = arith.constant 0 : i32
    return %arg0, %c0_i32 : i32, i32
  }
  func.func @transform_9(%arg0: i32, %arg1: i32) -> (i32, i32) {
    %c0_i32 = arith.constant 0 : i32
    %c0_i32_0 = arith.constant 0 : i32
    return %arg0, %c0_i32 : i32, i32
  }
}

</mosaic_0001>

<bundles_post_ra>
// kernel: tpu_custom_call.1
= control target key start
LH: loop header
LB: loop body
LE: loop exit
PB: predicated region body
PF: predicated region fallthrough
CT: control target
= control target key end

     0   :  { %15 = vsyncpa [#allocation6], 0  ;;  %s937_s0 = inlined_call_operand.hbm [shape: f32[16,32], index: 0, kind: input, shape index: {}]   ;;  %s938_s1 = inlined_call_operand.hbm [shape: f32[16,32], index: 1, kind: input, shape index: {}]   ;;  %s939_s2 = inlined_call_operand.hbm [shape: f32[16,32], index: 2, kind: input, shape index: {}]   ;;  %s940_s3 = inlined_call_operand.hbm [shape: bf16[32,32], index: 3, kind: input, shape index: {}]   ;;  %s941_s4 = inlined_call_operand.hbm [shape: bf16[32,32], index: 4, kind: input, shape index: {}]   ;;  %s942_s5 = inlined_call_operand.vmem [shape: bf16[32,32], index: 5, kind: input, shape index: {}]   ;;  %s943_s6 = inlined_call_operand.vmem [shape: f32[3,32], index: 6, kind: input, shape index: {}]   ;;  %s944_s7 = inlined_call_operand.hbm [shape: bf16[16,32], index: 7, kind: output, shape index: {0}]   ;;  %s945_s8 = inlined_call_operand.hbm [shape: bf16[16,32], index: 8, kind: output, shape index: {1}]   ;;  %s946_s9 = inlined_call_operand.hbm [shape: bf16[16,32], index: 9, kind: output, shape index: {2}]  }
   0x1   :  { %16 = vsyncpa [#allocation9], 0 }
   0x2   :  { %17 = vsyncpa [#allocation12], 0 }
   0x3   :  { %18 = vsyncpa [#allocation7], 0 }
   0x4   :  { %19 = vsyncpa [#allocation16], 0  ;;  %s693_s30 = smov [#allocation8]   ;;  %s694_s11 = smov [#allocation11]  }
   0x5   :  { %s37_s10 = sshll.u32 %s693_s30, 4  ;;  %s61_s12 = sshll.u32 %s694_s11, 4  ;;  %s38_s10 = int_to_ptr.vmem [resolvable:$true] %s37_s10  ;;  %s757_s12 = int_to_ptr.vmem [resolvable:$true] %s61_s12 }
   0x6   :  { %s507_s15 = scalar_lea.hbm %s938_s1, 256 }
   0x7   :  { %p508_p0 = scmp.ne.s32.totalorder %s938_s1, %s507_s15  ;;  %p511_p1 = scmp.lt.u32.totalorder %s507_s15, %s938_s1 }
   0x9   :  { %p513_p2 = pnand %p511_p1, %p508_p0 }
   0xb   :  { %516 = shalt.err (!%p513_p2)
}
   0xc   :  { %s517_s20 = scalar_lea.vmem %s38_s10, 256  ;;  %p522_p4 = scmp.lt.s32.totalorder %s38_s10, %s38_s10 }
   0xd   :  { %p518_p3 = scmp.ne.s32.totalorder %s38_s10, %s517_s20  ;;  %p523_p5 = scmp.lt.s32.totalorder %s517_s20, %s517_s20 }
   0xf   :  { %p524_p6 = por %p523_p5, %p522_p4 }
  0x11   :  { %p525_p7 = pnand %p524_p6, %p518_p3 }
  0x13   :  { %528 = shalt.err (!%p525_p7)
}
  0x14   :  { %s695_s21 = smov 128   ;;  %s696_s22 = smov 8  }
  0x15   :  { %43 = dma.hbm_to_vmem [thread:$0]  %s938_s1, 256, %s38_s10, [#allocation9], %s695_s21, %s695_s21, %s696_s22  }
  0x16   :  { %s529_s27 = scalar_lea.hbm %s940_s3, 256 }
  0x17   :  { %p530_p8 = scmp.ne.s32.totalorder %s940_s3, %s529_s27  ;;  %p533_p9 = scmp.lt.u32.totalorder %s529_s27, %s940_s3 }
  0x19   :  { %p535_p10 = pnand %p533_p9, %p530_p8 }
  0x1b   :  { %538 = shalt.err (!%p535_p10)
}
  0x1c   :  { %s539_s13 = scalar_lea.vmem %s757_s12, 256  ;;  %p544_p12 = scmp.lt.s32.totalorder %s757_s12, %s757_s12 }
  0x1d   :  { %p540_p11 = scmp.ne.s32.totalorder %s757_s12, %s539_s13  ;;  %p545_p13 = scmp.lt.s32.totalorder %s539_s13, %s539_s13 }
  0x1f   :  { %p546_p0 = por %p545_p13, %p544_p12 }
  0x21   :  { %p547_p1 = pnand %p546_p0, %p540_p11 }
  0x23   :  { %550 = shalt.err (!%p547_p1)
}
  0x24   :  { %s697_s1 = smov 64   ;;  %s698_s10 = smov 4  }
  0x25   :  { %67 = dma.hbm_to_vmem [thread:$0]  %s940_s3, 256, %s757_s12, [#allocation12], %s697_s1, %s697_s1, %s698_s10  }
  0x26   :  { %s699_s16 = smov [#allocation5]   ;;  %s700_s18 = smov [#allocation10]  }
  0x27   :  { %s25_s17 = sshll.u32 %s699_s16, 4  ;;  %s49_s19 = sshll.u32 %s700_s18, 4  ;;  %s26_s17 = int_to_ptr.vmem [resolvable:$true] %s25_s17  ;;  %s794_s19 = int_to_ptr.vmem [resolvable:$true] %s49_s19 }
  0x28   :  { %s551_s24 = scalar_lea.hbm %s937_s0, 256 }
  0x29   :  { %p552_p2 = scmp.ne.s32.totalorder %s937_s0, %s551_s24  ;;  %p555_p3 = scmp.lt.u32.totalorder %s551_s24, %s937_s0 }
  0x2b   :  { %p557_p4 = pnand %p555_p3, %p552_p2 }
  0x2d   :  { %560 = shalt.err (!%p557_p4)
}
  0x2e   :  { %s561_s3 = scalar_lea.vmem %s26_s17, 256  ;;  %p566_p6 = scmp.lt.s32.totalorder %s26_s17, %s26_s17 }
  0x2f   :  { %p562_p5 = scmp.ne.s32.totalorder %s26_s17, %s561_s3  ;;  %p567_p7 = scmp.lt.s32.totalorder %s561_s3, %s561_s3 }
  0x31   :  { %p568_p8 = por %p567_p7, %p566_p6 }
  0x33   :  { %p569_p9 = pnand %p568_p8, %p562_p5 }
  0x35   :  { %572 = shalt.err (!%p569_p9)
}
  0x36   :  { %31 = dma.hbm_to_vmem [thread:$0]  %s937_s0, 256, %s26_s17, [#allocation6], %s695_s21, %s695_s21, %s696_s22  }
  0x37   :  { %s573_s13 = scalar_lea.hbm %s939_s2, 256 }
  0x38   :  { %p574_p10 = scmp.ne.s32.totalorder %s939_s2, %s573_s13  ;;  %p577_p11 = scmp.lt.u32.totalorder %s573_s13, %s939_s2 }
  0x3a   :  { %p579_p12 = pnand %p577_p11, %p574_p10 }
  0x3c   :  { %582 = shalt.err (!%p579_p12)
}
  0x3d   :  { %s583_s20 = scalar_lea.vmem %s794_s19, 256  ;;  %p588_p0 = scmp.lt.s32.totalorder %s794_s19, %s794_s19 }
  0x3e   :  { %p584_p13 = scmp.ne.s32.totalorder %s794_s19, %s583_s20  ;;  %p589_p1 = scmp.lt.s32.totalorder %s583_s20, %s583_s20 }
  0x40   :  { %p590_p2 = por %p589_p1, %p588_p0 }
  0x42   :  { %p591_p3 = pnand %p590_p2, %p584_p13 }
  0x44   :  { %594 = shalt.err (!%p591_p3)
}
  0x45   :  { %55 = dma.hbm_to_vmem [thread:$0]  %s939_s2, 256, %s794_s19, [#allocation9], %s695_s21, %s695_s21, %s696_s22  }
  0x46   :  { %s701_s23 = smov [#allocation13]   ;;  %s595_s27 = scalar_lea.hbm %s941_s4, 256 }
  0x47   :  { %s73_s24 = sshll.u32 %s701_s23, 4  ;;  %p596_p4 = scmp.ne.s32.totalorder %s941_s4, %s595_s27  ;;  %s74_s24 = int_to_ptr.vmem [resolvable:$true] %s73_s24 }
  0x48   :  { %p599_p5 = scmp.lt.u32.totalorder %s595_s27, %s941_s4 }
  0x4a   :  { %p601_p6 = pnand %p599_p5, %p596_p4 }
  0x4c   :  { %604 = shalt.err (!%p601_p6)
}
  0x4d   :  { %s605_s30 = scalar_lea.vmem %s74_s24, 256  ;;  %p610_p8 = scmp.lt.s32.totalorder %s74_s24, %s74_s24 }
  0x4e   :  { %p606_p7 = scmp.ne.s32.totalorder %s74_s24, %s605_s30  ;;  %p611_p9 = scmp.lt.s32.totalorder %s605_s30, %s605_s30 }
  0x50   :  { %p612_p10 = por %p611_p9, %p610_p8 }
  0x52   :  { %p613_p11 = pnand %p612_p10, %p606_p7 }
  0x54   :  { %616 = shalt.err (!%p613_p11)
}
  0x55   :  { %79 = dma.hbm_to_vmem [thread:$0]  %s941_s4, 256, %s74_s24, [#allocation12], %s697_s1, %s697_s1, %s698_s10  }
  0x56   :  { %683 = dma.done.wait [#allocation6], 256  }
  0x57   :  { %684 = vsyncadd [#allocation6], 4294967040 }
  0x58   :  { %685 = dma.done.wait [#allocation9], 512  }
  0x59   :  { %686 = vsyncadd [#allocation9], 4294966784 }
  0x5a   :  { %687 = dma.done.wait [#allocation12], 512  }
  0x5b   :  { %688 = vsyncadd [#allocation12], 4294966784  ;;  %vm104_vm0 = vcmask 261120   ;;  %v702_v0 = vmov 0.0   ;;  %vm703_vm1 = vmmov 0   ;;  %v501_v1 = vld [vmem:[#allocation11] sm:$0xff]  }
  0x5c   :  { %463 = vmatprep.subr.bf16.mxu0 %v702_v0  ;;  %471 = vmatprep.subr.bf16.mxu1 %v702_v0  ;;  %105 = vst.msk [vmem:[#allocation2] sm:$0xff] %vm104_vm0, %v702_v0  ;;  %106 = vst.msk [vmem:[#allocation2 + $0x8] sm:$0xff] %vm104_vm0, %v702_v0  ;;  %v502_v2 = vld [vmem:[#allocation11 + $0x8] sm:$0xff]   ;;  %v503_v3 = vld [vmem:[#allocation13] sm:$0xff]   ;;  %vm339_vm2 = vcmask 257024   ;;  %s704_s16 = smov [#allocation14]  }
  0x5d   :  { %107 = vst.msk [vmem:[#allocation3] sm:$0xff] %vm104_vm0, %v702_v0  ;;  %108 = vst.msk [vmem:[#allocation3 + $0x8] sm:$0xff] %vm104_vm0, %v702_v0  ;;  %467 = vmatprep.mubr.msk.bf16.mxu0 %vm703_vm1, %v702_v0  ;;  %475 = vmatprep.mubr.msk.bf16.mxu1 %vm703_vm1, %v702_v0  ;;  %v113_v4 = vld [vmem:[#allocation5] sm:$0xff]  ;;  %v114_v5 = vld [vmem:[#allocation5 + $0x8] sm:$0xff]  ;;  %s385_s18 = sshll.u32 %s704_s16, 4  ;;  %s705_s20 = smov [#allocation15]   ;;  %s386_s18 = int_to_ptr.vmem [resolvable:$true] %s385_s18 }
  0x5e   :  { %109 = vst.msk [vmem:[#allocation4] sm:$0xff] %vm104_vm0, %v702_v0  ;;  %110 = vst.msk [vmem:[#allocation4 + $0x8] sm:$0xff] %vm104_vm0, %v702_v0  ;;  %464 = vmatpush3.bf16.msra.mxu0 %v501_v1  ;;  %472 = vmatpush3.bf16.msra.mxu1 %v503_v3  ;;  %v504_v6 = vld [vmem:[%s942_s5] sm:$0xff]   ;;  %v115_v7 = vpack.c.bf16 %v114_v5, %v113_v4  ;;  %v505_v8 = vld [vmem:[#allocation13 + $0x8] sm:$0xff]   ;;  %s397_s0 = sshll.u32 %s705_s20, 4  ;;  %s617_s24 = scalar_lea.vmem %s386_s18, 128  ;;  %s881_s0 = int_to_ptr.vmem [resolvable:$true] %s397_s0 }
  0x5f   :  { %465 = vmatprep.subr.bf16.mxu0 %v702_v0  ;;  %473 = vmatprep.subr.bf16.mxu1 %v702_v0  ;;  %v183_v9 = vld [vmem:[#allocation8] sm:$0xff]  ;;  %v184_v10 = vld [vmem:[#allocation8 + $0x8] sm:$0xff]  ;;  %v252_v13 = vld [vmem:[#allocation10] sm:$0xff]  ;;  %p618_p12 = scmp.ne.s32.totalorder %s386_s18, %s617_s24  ;;  %p622_p13 = scmp.lt.s32.totalorder %s386_s18, %s386_s18 }
  0x60   :  { %v185_v11 = vpack.c.bf16 %v184_v10, %v183_v9  ;;  %v506_v12 = vld [vmem:[%s942_s5 + $0x8] sm:$0xff]   ;;  %v253_v14 = vld [vmem:[#allocation10 + $0x8] sm:$0xff]  ;;  %v439_v35 = vld [vmem:[%s943_s6] ss:$0 sm:$0xff]  ;;  %p623_p0 = scmp.lt.s32.totalorder %s617_s24, %s617_s24 }
  0x61   :  { %v254_v15 = vpack.c.bf16 %v253_v14, %v252_v13  ;;  %v442_v39 = vld [vmem:[%s943_s6 + $0x1] ss:$0 sm:$0xff]  ;;  %v445_v53 = vld [vmem:[%s943_s6 + $0x2] ss:$0 sm:$0xff] }
  0x62   :  { %466 = vmatpush3.bf16.msra.mxu0 %v502_v2  ;;  %474 = vmatpush3.bf16.msra.mxu1 %v505_v8  ;;  %p624_p1 = por %p623_p0, %p622_p13 }
  0x63   :  { %479 = vmatprep.subr.bf16.mxu0 %v702_v0  ;;  %v111_v16 = vld [vmem:[#allocation2] sm:$0xff]  ;;  %v112_v18 = vld [vmem:[#allocation2 + $0x8] sm:$0xff] }
  0x64   :  { %v181_v19 = vld [vmem:[#allocation3] sm:$0xff]  ;;  %v182_v24 = vld [vmem:[#allocation3 + $0x8] sm:$0xff]  ;;  %p625_p2 = pnand %p624_p1, %p618_p12 }
  0x65   :  { %468 = vmatmul.mubr.msk.bf16.vlgmr.msra.gmra.mrb[0].mxu0 %vm104_vm0, %v115_v7  ;;  %476 = vmatmul.mubr.msk.bf16.vlgmr.msra.gmra.mrb[0].mxu1 %vm104_vm0, %v185_v11  ;;  %v250_v32 = vld [vmem:[#allocation4] sm:$0xff]  ;;  %v251_v34 = vld [vmem:[#allocation4 + $0x8] sm:$0xff] }
  0x66   :  { %480 = vmatpush3.bf16.msra.mxu0 %v504_v6  ;;  %483 = vmatprep.mubr.msk.bf16.mxu0 %vm703_vm1, %v702_v0 }
  0x67   :  { %481 = vmatprep.subr.bf16.mxu0 %v702_v0 }
  0x6a   :  { %482 = vmatpush3.bf16.msra.mxu0 %v506_v12 }
  0x6d   :  { %484 = vmatmul.mubr.msk.bf16.vlgmr.msra.gmra.mrb[4].mxu0 %vm104_vm0, %v254_v15 }
 0x138   :  { %v170_v17 = vpop.f32.mrb[0].mxu0  ;;  %v239_v23 = vpop.f32.mrb[0].mxu1 }
 0x139   :  { %v177_v20 = vadd.f32 %v170_v17, %v111_v16  ;;  %v469_v21 = vpop.f32.mrb[1].mxu0  ;;  %v246_v27 = vadd.f32 %v239_v23, %v181_v19  ;;  %v477_v28 = vpop.f32.mrb[1].mxu1 }
 0x13a   :  { %v173_v22 = vpop.f32.mrb[2].mxu0  ;;  %v242_v29 = vpop.f32.mrb[2].mxu1 }
 0x13b   :  { %179 = vst.msk [vmem:[#allocation2] sm:$0xff] %vm104_vm0, %v177_v20  ;;  %v178_v25 = vadd.f32 %v173_v22, %v112_v18  ;;  %v470_v26 = vpop.f32.mrb[3].mxu0  ;;  %248 = vst.msk [vmem:[#allocation3] sm:$0xff] %vm104_vm0, %v246_v27  ;;  %v247_v30 = vadd.f32 %v242_v29, %v182_v24  ;;  %v478_v31 = vpop.f32.mrb[3].mxu1 }
 0x13d   :  { %180 = vst.msk [vmem:[#allocation2 + $0x8] sm:$0xff] %vm104_vm0, %v178_v25  ;;  %249 = vst.msk [vmem:[#allocation3 + $0x8] sm:$0xff] %vm104_vm0, %v247_v30 }
 0x140   :  { %v308_v33 = vpop.f32.mrb[4].mxu0 }
 0x141   :  { %v315_v36 = vadd.f32 %v308_v33, %v250_v32  ;;  %v485_v37 = vpop.f32.mrb[5].mxu0 }
 0x142   :  { %v311_v38 = vpop.f32.mrb[6].mxu0  ;;  %v322_v40 = vld [vmem:[#allocation2] sm:$0xff]  ;;  %v342_v44 = vld [vmem:[#allocation3] sm:$0xff] }
 0x143   :  { %317 = vst.msk [vmem:[#allocation4] sm:$0xff] %vm104_vm0, %v315_v36  ;;  %v316_v41 = vadd.f32 %v311_v38, %v251_v34  ;;  %v486_v42 = vpop.f32.mrb[7].mxu0  ;;  %v329_v43 = vadd.f32 %v439_v35, %v322_v40  ;;  %v349_v46 = vadd.f32 %v442_v39, %v342_v44 }
 0x144   :  { %v323_v45 = vld [vmem:[#allocation2 + $0x8] sm:$0xff]  ;;  %v343_v49 = vld [vmem:[#allocation3 + $0x8] sm:$0xff] }
 0x145   :  { %318 = vst.msk [vmem:[#allocation4 + $0x8] sm:$0xff] %vm104_vm0, %v316_v41  ;;  %v330_v47 = vadd.f32 %v439_v35, %v323_v45  ;;  %v448_v48 = vpack.c.bf16 %v329_v43, %v329_v43  ;;  %v350_v50 = vadd.f32 %v442_v39, %v343_v49  ;;  %v450_v51 = vpack.c.bf16 %v349_v46, %v349_v46 }
 0x147   :  { %v449_v52 = vpack.c.bf16 %v330_v47, %v330_v47  ;;  %340 = vst.msk [vmem:[#allocation14] sm:$0xf] %vm339_vm2, %v448_v48  ;;  %v451_v54 = vpack.c.bf16 %v350_v50, %v350_v50  ;;  %359 = vst.msk [vmem:[#allocation15] sm:$0xf] %vm339_vm2, %v450_v51 }
 0x149   :  { %341 = vst.msk [vmem:[#allocation14 + $0x4] sm:$0xf] %vm339_vm2, %v449_v52 }
 0x14a   :  { %628 = shalt.err (!%p625_p2)
}
 0x14b   :  { %s629_s27 = scalar_lea.hbm %s944_s7, 128 }
 0x14c   :  { %p630_p3 = scmp.ne.s32.totalorder %s944_s7, %s629_s27  ;;  %p633_p4 = scmp.lt.u32.totalorder %s629_s27, %s944_s7 }
 0x14e   :  { %p635_p5 = pnand %p633_p4, %p630_p3 }
 0x150   :  { %638 = shalt.err (!%p635_p5)
}
 0x151   :  { %391 = dma.vmem_to_hbm [thread:$0]  %s386_s18, 128, %s944_s7, [#allocation7], %s697_s1, %s697_s1, %s698_s10   ;;  %v361_v55 = vld [vmem:[#allocation4] sm:$0xff]  ;;  %360 = vst.msk [vmem:[#allocation15 + $0x4] sm:$0xf] %vm339_vm2, %v451_v54 }
 0x152   :  { %v368_v56 = vadd.f32 %v445_v53, %v361_v55  ;;  %s706_s2 = smov [#allocation17]   ;;  %s639_s4 = scalar_lea.vmem %s881_s0, 128 }
 0x153   :  { %s409_s21 = sshll.u32 %s706_s2, 4  ;;  %p640_p6 = scmp.ne.s32.totalorder %s881_s0, %s639_s4  ;;  %s410_s21 = int_to_ptr.vmem [resolvable:$true] %s409_s21 }
 0x154   :  { %p644_p7 = scmp.lt.s32.totalorder %s881_s0, %s881_s0  ;;  %p645_p8 = scmp.lt.s32.totalorder %s639_s4, %s639_s4 }
 0x156   :  { %p646_p9 = por %p645_p8, %p644_p7 }
 0x158   :  { %p647_p10 = pnand %p646_p9, %p640_p6 }
 0x15a   :  { %650 = shalt.err (!%p647_p10)
}
 0x15b   :  { %s651_s11 = scalar_lea.hbm %s945_s8, 128 }
 0x15c   :  { %p652_p11 = scmp.ne.s32.totalorder %s945_s8, %s651_s11  ;;  %p655_p12 = scmp.lt.u32.totalorder %s651_s11, %s945_s8 }
 0x15e   :  { %p657_p13 = pnand %p655_p12, %p652_p11 }
 0x160   :  { %660 = shalt.err (!%p657_p13)
}
 0x161   :  { %403 = dma.vmem_to_hbm [thread:$0]  %s881_s0, 128, %s945_s8, [#allocation16], %s697_s1, %s697_s1, %s698_s10   ;;  %v362_v57 = vld [vmem:[#allocation4 + $0x8] sm:$0xff]  ;;  %v452_v59 = vpack.c.bf16 %v368_v56, %v368_v56 }
 0x162   :  { %v369_v58 = vadd.f32 %v445_v53, %v362_v57  ;;  %s661_s18 = scalar_lea.vmem %s410_s21, 128  ;;  %p666_p1 = scmp.lt.s32.totalorder %s410_s21, %s410_s21 }
 0x163   :  { %378 = vst.msk [vmem:[#allocation17] sm:$0xf] %vm339_vm2, %v452_v59  ;;  %p662_p0 = scmp.ne.s32.totalorder %s410_s21, %s661_s18  ;;  %p667_p2 = scmp.lt.s32.totalorder %s661_s18, %s661_s18 }
 0x164   :  { %v453_v60 = vpack.c.bf16 %v369_v58, %v369_v58 }
 0x165   :  { %p668_p3 = por %p667_p2, %p666_p1 }
 0x166   :  { %379 = vst.msk [vmem:[#allocation17 + $0x4] sm:$0xf] %vm339_vm2, %v453_v60 }
 0x167   :  { %p669_p4 = pnand %p668_p3, %p662_p0 }
 0x169   :  { %672 = shalt.err (!%p669_p4)
}
 0x16a   :  { %s673_s8 = scalar_lea.hbm %s946_s9, 128 }
 0x16b   :  { %p674_p5 = scmp.ne.s32.totalorder %s946_s9, %s673_s8  ;;  %p677_p6 = scmp.lt.u32.totalorder %s673_s8, %s946_s9 }
 0x16d   :  { %p679_p7 = pnand %p677_p6, %p674_p5 }
 0x16f   :  { %682 = shalt.err (!%p679_p7)
}
 0x170   :  { %415 = dma.vmem_to_hbm [thread:$0]  %s410_s21, 128, %s946_s9, [#allocation16], %s697_s1, %s697_s1, %s698_s10  }
 0x171   :  { %689 = dma.done.wait [#allocation7], 128  }
 0x172   :  { %690 = vsyncadd [#allocation7], 4294967168 }
 0x173   :  { %691 = dma.done.wait [#allocation16], 256  }
 0x174   :  { %692 = vsyncadd [#allocation16], 4294967040 }
 0x175   :  { %425 = vsyncpa [#allocation6], 1 }
 0x176   :  { %426 = vsyncpa [#allocation9], 1 }
 0x177   :  { %427 = vsyncpa [#allocation12], 1 }
 0x178   :  { %428 = vsyncpa [#allocation7], 1 }
 0x179   :  { %429 = vsyncpa [#allocation16], 1 }

</bundles_post_ra>
